<compile_context>
chip_gen: v6e
topology: v6e:2x2x1
jax: 0.10.0
libtpu: 0.0.40
codegen_flags: <defaults>
</compile_context>

<pallas_src>
import jax
import jax.numpy as jnp
from jax.experimental import pallas as pl
from jax.experimental.pallas import tpu as pltpu


# ---------------------------------------------------------------------------
# Kernels
# ---------------------------------------------------------------------------
def _cam_head_kernel_single(x_ref, w_ref, f_ref, cls_ref):
    """Whole HW in one tile per batch element; grid = (B,), fully parallel.

    x_ref:   (1, C, HW)   feature tile (bf16 from producer, or f32 -> cast)
    w_ref:   (NC, C)      bf16 classifier weight (1x1 conv)
    f_ref:   (1, NC, HW)  bf16 CAM output (lane-dense along HW)
    cls_ref: (1, NC, 1)   f32 logits = max over HW of the bf16 CAM values
    """
    x = x_ref[0].astype(jnp.bfloat16)            # no-op if producer is bf16
    acc = jnp.dot(w_ref[...], x, preferred_element_type=jnp.float32)
    f_bf = acc.astype(jnp.bfloat16)
    f_ref[0] = f_bf
    # max over the bf16-rounded values so cls == max(f) exactly
    cls_ref[0] = jnp.max(f_bf.astype(jnp.float32), axis=-1, keepdims=True)


def _make_cam_head_kernel_tiled(t_hw, hw_valid, padded_hw):
    """Kernel for HW tiled into n_hw > 1 tiles of t_hw lanes (t_hw % 128 == 0).

    Running max kept lane-wide in a (NC, 128) f32 VMEM scratch (VPU-only per
    tile); single cross-lane reduce + (NC,1) store at the last hw step.
    """
    n_groups = t_hw // 128
    padded = padded_hw != hw_valid

    def kernel(x_ref, w_ref, f_ref, cls_ref, m_scr):
        hw = pl.program_id(1)
        x = x_ref[0].astype(jnp.bfloat16)
        acc = jnp.dot(w_ref[...], x, preferred_element_type=jnp.float32)
        f_bf = acc.astype(jnp.bfloat16)
        f_ref[0] = f_bf

        fm = f_bf.astype(jnp.float32)
        if padded:
            # mask the zero-padded HW columns out of the max (static bound)
            col = hw * t_hw + jax.lax.broadcasted_iota(jnp.int32, fm.shape, 1)
            fm = jnp.where(col < hw_valid, fm, -jnp.inf)

        # fold 128-lane groups with elementwise maxima (VPU only)
        m = fm[:, :128]
        for g in range(1, n_groups):
            m = jnp.maximum(m, fm[:, g * 128:(g + 1) * 128])

        @pl.when(hw == 0)
        def _():
            m_scr[...] = m

        @pl.when(hw > 0)
        def _():
            m_scr[...] = jnp.maximum(m_scr[...], m)

        @pl.when(hw == pl.num_programs(1) - 1)
        def _():
            cls_ref[0] = jnp.max(m_scr[...], axis=-1, keepdims=True)

    return kernel


# ---------------------------------------------------------------------------
# HW tile planner: big lane-dense tiles, capped by an explicit VMEM budget.
# Returns (padded_hw, t_hw, n_hw).
# ---------------------------------------------------------------------------
def _plan_hw_tiling(hw, x_bytes, f_bytes, c, nc,
                    target_lanes=8192, vmem_budget_bytes=16 * 1024 * 1024):
    # double-buffered x tile + f tile per lane
    bytes_per_lane = 2 * (c * x_bytes + nc * f_bytes)
    max_lanes = max(128, vmem_budget_bytes // bytes_per_lane)
    limit = int(min(target_lanes, max_lanes))
    if hw <= limit:
        return hw, hw, 1                       # single full-HW tile
    # prefer an exact multiple-of-128 divisor (no padding needed)
    t_cap = (limit // 128) * 128
    t = t_cap
    while t >= 128:
        if hw % t == 0:
            return hw, t, hw // t
        t -= 128
    # no divisor: pad HW up to a multiple of the largest allowed tile
    padded = ((hw + t_cap - 1) // t_cap) * t_cap
    return padded, t_cap, padded // t_cap


# ---------------------------------------------------------------------------
# CAM head: 1x1 conv (no bias) + AdaptiveMaxPool2d(1), via Pallas.
# ---------------------------------------------------------------------------
def cam_head(x_nchw, w_conv, *, hw_tile_target=8192,
             vmem_budget_bytes=16 * 1024 * 1024):
    """x_nchw: (B, C, H, W) bf16 (preferred) or f32; w_conv: (NC, C, 1, 1) f32.

    Returns: cls (B, NC) f32, f (B, NC, H, W) bf16.
    """
    B, C, H, W = x_nchw.shape
    NC = w_conv.shape[0]
    HW = H * W

    x = x_nchw.reshape(B, C, HW)                 # free reshape, no dtype copy
    w = w_conv[:, :, 0, 0].astype(jnp.bfloat16)  # tiny

    x_bytes = jnp.dtype(x.dtype).itemsize
    padded_hw, t_hw, n_hw = _plan_hw_tiling(
        HW, x_bytes, 2, C, NC, hw_tile_target, vmem_budget_bytes)
    padded = padded_hw != HW
    if padded:
        x = jnp.pad(x, ((0, 0), (0, 0), (0, padded_hw - HW)))

    cost = pl.CostEstimate(
        flops=2 * B * HW * C * NC,
        transcendentals=0,
        bytes_accessed=(B * C * HW * x_bytes + w.size * 2
                        + B * NC * HW * 2 + B * NC * 4),
    )
    out_shape = (
        jax.ShapeDtypeStruct((B, NC, padded_hw), jnp.bfloat16),
        jax.ShapeDtypeStruct((B, NC, 1), jnp.float32),
    )
    cparams = dict(vmem_limit_bytes=32 * 1024 * 1024)

    if n_hw == 1:
        f_flat, cls = pl.pallas_call(
            _cam_head_kernel_single,
            out_shape=out_shape,
            grid=(B,),
            in_specs=[
                pl.BlockSpec((1, C, padded_hw), lambda b: (b, 0, 0)),
                pl.BlockSpec((NC, C), lambda b: (0, 0)),
            ],
            out_specs=(
                pl.BlockSpec((1, NC, padded_hw), lambda b: (b, 0, 0)),
                pl.BlockSpec((1, NC, 1), lambda b: (b, 0, 0)),
            ),
            compiler_params=pltpu.CompilerParams(
                dimension_semantics=("parallel",), **cparams),
            cost_estimate=cost,
        )(x, w)
    else:
        kernel = _make_cam_head_kernel_tiled(t_hw, HW, padded_hw)
        f_flat, cls = pl.pallas_call(
            kernel,
            out_shape=out_shape,
            grid=(B, n_hw),
            in_specs=[
                pl.BlockSpec((1, C, t_hw), lambda b, hw: (b, 0, hw)),
                pl.BlockSpec((NC, C), lambda b, hw: (0, 0)),
            ],
            out_specs=(
                pl.BlockSpec((1, NC, t_hw), lambda b, hw: (b, 0, hw)),
                pl.BlockSpec((1, NC, 1), lambda b, hw: (b, 0, 0)),
            ),
            scratch_shapes=[pltpu.VMEM((NC, 128), jnp.float32)],
            compiler_params=pltpu.CompilerParams(
                dimension_semantics=("parallel", "arbitrary"), **cparams),
            cost_estimate=cost,
        )(x, w)

    if padded:
        f_flat = f_flat[:, :, :HW]
    f = f_flat.reshape(B, NC, H, W)              # free reshape, NCHW-ordered
    return cls.reshape(B, NC), f


# ---------------------------------------------------------------------------
# Deterministic stand-in for the MiT encoder (plain JAX glue).
# Emits bf16 features so the CAM head reads bf16 directly (no wrapper cast).
# ---------------------------------------------------------------------------
def stand_in_encoder(x, proj_weights, strides=(4, 2, 2, 2)):
    feats = []
    cur = x
    for w, s in zip(proj_weights, strides):
        B, C, H, W = cur.shape
        cur = cur.reshape(B, C, H // s, s, W // s, s).mean(axis=(3, 5))
        cur = jnp.einsum("bchw,dc->bdhw", cur, w)
        cur = jax.nn.gelu(cur)
        feats.append(cur.astype(jnp.bfloat16))   # producer emits bf16
    return feats


# ---------------------------------------------------------------------------
# Full forward (with_cam=True): returns (cls1..cls4, f1..f4)
# ---------------------------------------------------------------------------
def mitcls_cam_multi4_forward(x, encoder_weights, classifier_weights):
    x1, x2, x3, x4 = stand_in_encoder(x, encoder_weights)
    cls1, f1 = cam_head(x1, classifier_weights[0])
    cls2, f2 = cam_head(x2, classifier_weights[1])
    cls3, f3 = cam_head(x3, classifier_weights[2])
    cls4, f4 = cam_head(x4, classifier_weights[3])
    return cls1, cls2, cls3, cls4, f1, f2, f3, f4


if __name__ == "__main__":
    key = jax.random.PRNGKey(0)

    num_classes = 20
    in_chans = 3
    embed_dims = [32, 64, 96, 128]          # small stand-in for mit_b2 dims
    B, H, W = 2, 64, 64                      # strides 4/8/16/32 -> HW 256..4

    keys = jax.random.split(key, 1 + 2 * len(embed_dims))
    x = jax.random.normal(keys[0], (B, in_chans, H, W), dtype=jnp.float32)

    # stand-in encoder projection weights (deterministic)
    enc_w = []
    prev_c = in_chans
    for i, d in enumerate(embed_dims):
        enc_w.append(0.1 * jax.random.normal(keys[1 + i], (d, prev_c),
                                             dtype=jnp.float32))
        prev_c = d

    # classifier_i: Conv2d(embed_dims[i], num_classes, kernel_size=1, bias=False)
    cls_w = []
    for i, d in enumerate(embed_dims):
        cls_w.append(0.1 * jax.random.normal(keys[1 + len(embed_dims) + i],
                                             (num_classes, d, 1, 1),
                                             dtype=jnp.float32))

    outs = jax.jit(mitcls_cam_multi4_forward)(x, enc_w, cls_w)
    outs = jax.block_until_ready(outs)
    cls1, cls2, cls3, cls4, f1, f2, f3, f4 = outs

    # reference check against plain JAX (same bf16 features/weights as kernel)
    feats = stand_in_encoder(x, enc_w)
    ok = True
    for feat, w, cls_out, f_out in zip(feats, cls_w,
                                       (cls1, cls2, cls3, cls4),
                                       (f1, f2, f3, f4)):
        xb = feat.astype(jnp.float32)
        wb = w[:, :, 0, 0].astype(jnp.bfloat16).astype(jnp.float32)
        f_ref = jnp.einsum("bchw,nc->bnhw", xb, wb)
        cls_ref = jnp.max(f_ref, axis=(2, 3))
        ok &= bool(jnp.allclose(f_out.astype(jnp.float32), f_ref,
                                atol=1e-3, rtol=1e-3))
        ok &= bool(jnp.allclose(cls_out, cls_ref, atol=1e-3, rtol=1e-3))
        # cls must equal the max of the kernel's own (bf16) CAM output exactly
        ok &= bool(jnp.allclose(cls_out,
                                jnp.max(f_out, axis=(2, 3)).astype(jnp.float32),
                                atol=1e-6, rtol=1e-6))

    assert ok, "Pallas CAM head mismatch vs reference"
    assert cls1.shape == (B, num_classes) and f4.shape == (B, num_classes, 2, 2)
    print("KERNEL_OK")
</pallas_src>

<mosaic_0001>
module attributes {stable_mosaic.version = 11 : i64} {
  func.func @_cam_head_kernel_single(%arg0: i32, %arg1: memref<1x128x4xbf16, #tpu.memory_space<vmem>>, %arg2: memref<20x128xbf16, #tpu.memory_space<vmem>>, %arg3: memref<1x20x4xbf16, #tpu.memory_space<vmem>>, %arg4: memref<1x20x1xf32, #tpu.memory_space<vmem>>) attributes {dimension_semantics = [#tpu.dimension_semantics<parallel>], iteration_bounds = array<i64: 2>, scalar_prefetch = 0 : i64, scratch_operands = 0 : i64, tpu.core_type = #tpu.core_type<tc>, window_params = [{transform_indices = @transform_0, window_bounds = array<i64: 1, 128, 4>}, {pipeline_mode = #tpu.pipeline_mode<synchronous>, transform_indices = @transform_1, window_bounds = array<i64: 20, 128>}, {transform_indices = @transform_2, window_bounds = array<i64: 1, 20, 4>}, {transform_indices = @transform_3, window_bounds = array<i64: 1, 20, 1>}]} {
    %c0 = arith.constant 0 : index
    %c0_0 = arith.constant 0 : index
    %c0_1 = arith.constant 0 : index
    %0 = vector.load %arg1[%c0, %c0_0, %c0_1] : memref<1x128x4xbf16, #tpu.memory_space<vmem>>, vector<1x128x4xbf16>
    %1 = vector.shape_cast %0 : vector<1x128x4xbf16> to vector<128x4xbf16>
    %c0_2 = arith.constant 0 : index
    %c0_3 = arith.constant 0 : index
    %2 = vector.load %arg2[%c0_2, %c0_3] : memref<20x128xbf16, #tpu.memory_space<vmem>>, vector<20x128xbf16>
    %cst = arith.constant dense<0.000000e+00> : vector<20x4xf32>
    %3 = tpu.matmul %2, %1, %cst {dimension_numbers = #tpu.dot_dimension_numbers<[1], [0], [0], [1], [0, 0, 1, 1], [], []>} : vector<20x128xbf16>, vector<128x4xbf16>, vector<20x4xf32> -> vector<20x4xf32>
    %4 = arith.truncf %3 : vector<20x4xf32> to vector<20x4xbf16>
    %c0_4 = arith.constant 0 : index
    %c0_5 = arith.constant 0 : index
    %c0_6 = arith.constant 0 : index
    %5 = vector.load %arg3[%c0_4, %c0_5, %c0_6] : memref<1x20x4xbf16, #tpu.memory_space<vmem>>, vector<1x20x4xbf16>
    %6 = vector.shape_cast %5 : vector<1x20x4xbf16> to vector<20x4xbf16>
    %7 = vector.shape_cast %4 : vector<20x4xbf16> to vector<1x20x4xbf16>
    tpu.vector_store %arg3[%c0_4, %c0_5, %c0_6], %7 {strides = array<i32>} : memref<1x20x4xbf16, #tpu.memory_space<vmem>>, vector<1x20x4xbf16>,
    %8 = arith.extf %4 : vector<20x4xbf16> to vector<20x4xf32>
    %cst_7 = arith.constant dense<0xFF800000> : vector<20xf32>
    %9 = vector.multi_reduction <maximumf>, %8, %cst_7 [1] : vector<20x4xf32> to vector<20xf32>
    %10 = vector.shape_cast %9 : vector<20xf32> to vector<20x1xf32>
    %c0_8 = arith.constant 0 : index
    %c0_9 = arith.constant 0 : index
    %c0_10 = arith.constant 0 : index
    %11 = vector.load %arg4[%c0_8, %c0_9, %c0_10] : memref<1x20x1xf32, #tpu.memory_space<vmem>>, vector<1x20x1xf32>
    %12 = vector.shape_cast %11 : vector<1x20x1xf32> to vector<20x1xf32>
    %13 = vector.shape_cast %10 : vector<20x1xf32> to vector<1x20x1xf32>
    tpu.vector_store %arg4[%c0_8, %c0_9, %c0_10], %13 {strides = array<i32>} : memref<1x20x1xf32, #tpu.memory_space<vmem>>, vector<1x20x1xf32>,
    return
  }
  func.func @transform_0(%arg0: i32) -> (i32, i32, i32) {
    %c0_i32 = arith.constant 0 : i32
    %c0_i32_0 = arith.constant 0 : i32
    %c0_i32_1 = arith.constant 0 : i32
    return %arg0, %c0_i32, %c0_i32_0 : i32, i32, i32
  }
  func.func @transform_1(%arg0: i32) -> (i32, i32) {
    %c0_i32 = arith.constant 0 : i32
    %c0_i32_0 = arith.constant 0 : i32
    %c0_i32_1 = arith.constant 0 : i32
    return %c0_i32, %c0_i32_0 : i32, i32
  }
  func.func @transform_2(%arg0: i32) -> (i32, i32, i32) {
    %c0_i32 = arith.constant 0 : i32
    %c0_i32_0 = arith.constant 0 : i32
    %c0_i32_1 = arith.constant 0 : i32
    return %arg0, %c0_i32, %c0_i32_0 : i32, i32, i32
  }
  func.func @transform_3(%arg0: i32) -> (i32, i32, i32) {
    %c0_i32 = arith.constant 0 : i32
    %c0_i32_0 = arith.constant 0 : i32
    %c0_i32_1 = arith.constant 0 : i32
    return %arg0, %c0_i32, %c0_i32_0 : i32, i32, i32
  }
}

module attributes {stable_mosaic.version = 11 : i64} {
  func.func @_cam_head_kernel_single(%arg0: i32, %arg1: memref<1x96x16xbf16, #tpu.memory_space<vmem>>, %arg2: memref<20x96xbf16, #tpu.memory_space<vmem>>, %arg3: memref<1x20x16xbf16, #tpu.memory_space<vmem>>, %arg4: memref<1x20x1xf32, #tpu.memory_space<vmem>>) attributes {dimension_semantics = [#tpu.dimension_semantics<parallel>], iteration_bounds = array<i64: 2>, scalar_prefetch = 0 : i64, scratch_operands = 0 : i64, tpu.core_type = #tpu.core_type<tc>, window_params = [{transform_indices = @transform_0, window_bounds = array<i64: 1, 96, 16>}, {pipeline_mode = #tpu.pipeline_mode<synchronous>, transform_indices = @transform_1, window_bounds = array<i64: 20, 96>}, {transform_indices = @transform_2, window_bounds = array<i64: 1, 20, 16>}, {transform_indices = @transform_3, window_bounds = array<i64: 1, 20, 1>}]} {
    %c0 = arith.constant 0 : index
    %c0_0 = arith.constant 0 : index
    %c0_1 = arith.constant 0 : index
    %0 = vector.load %arg1[%c0, %c0_0, %c0_1] : memref<1x96x16xbf16, #tpu.memory_space<vmem>>, vector<1x96x16xbf16>
    %1 = vector.shape_cast %0 : vector<1x96x16xbf16> to vector<96x16xbf16>
    %c0_2 = arith.constant 0 : index
    %c0_3 = arith.constant 0 : index
    %2 = vector.load %arg2[%c0_2, %c0_3] : memref<20x96xbf16, #tpu.memory_space<vmem>>, vector<20x96xbf16>
    %cst = arith.constant dense<0.000000e+00> : vector<20x16xf32>
    %3 = tpu.matmul %2, %1, %cst {dimension_numbers = #tpu.dot_dimension_numbers<[1], [0], [0], [1], [0, 0, 1, 1], [], []>} : vector<20x96xbf16>, vector<96x16xbf16>, vector<20x16xf32> -> vector<20x16xf32>
    %4 = arith.truncf %3 : vector<20x16xf32> to vector<20x16xbf16>
    %c0_4 = arith.constant 0 : index
    %c0_5 = arith.constant 0 : index
    %c0_6 = arith.constant 0 : index
    %5 = vector.load %arg3[%c0_4, %c0_5, %c0_6] : memref<1x20x16xbf16, #tpu.memory_space<vmem>>, vector<1x20x16xbf16>
    %6 = vector.shape_cast %5 : vector<1x20x16xbf16> to vector<20x16xbf16>
    %7 = vector.shape_cast %4 : vector<20x16xbf16> to vector<1x20x16xbf16>
    tpu.vector_store %arg3[%c0_4, %c0_5, %c0_6], %7 {strides = array<i32>} : memref<1x20x16xbf16, #tpu.memory_space<vmem>>, vector<1x20x16xbf16>,
    %8 = arith.extf %4 : vector<20x16xbf16> to vector<20x16xf32>
    %cst_7 = arith.constant dense<0xFF800000> : vector<20xf32>
    %9 = vector.multi_reduction <maximumf>, %8, %cst_7 [1] : vector<20x16xf32> to vector<20xf32>
    %10 = vector.shape_cast %9 : vector<20xf32> to vector<20x1xf32>
    %c0_8 = arith.constant 0 : index
    %c0_9 = arith.constant 0 : index
    %c0_10 = arith.constant 0 : index
    %11 = vector.load %arg4[%c0_8, %c0_9, %c0_10] : memref<1x20x1xf32, #tpu.memory_space<vmem>>, vector<1x20x1xf32>
    %12 = vector.shape_cast %11 : vector<1x20x1xf32> to vector<20x1xf32>
    %13 = vector.shape_cast %10 : vector<20x1xf32> to vector<1x20x1xf32>
    tpu.vector_store %arg4[%c0_8, %c0_9, %c0_10], %13 {strides = array<i32>} : memref<1x20x1xf32, #tpu.memory_space<vmem>>, vector<1x20x1xf32>,
    return
  }
  func.func @transform_0(%arg0: i32) -> (i32, i32, i32) {
    %c0_i32 = arith.constant 0 : i32
    %c0_i32_0 = arith.constant 0 : i32
    %c0_i32_1 = arith.constant 0 : i32
    return %arg0, %c0_i32, %c0_i32_0 : i32, i32, i32
  }
  func.func @transform_1(%arg0: i32) -> (i32, i32) {
    %c0_i32 = arith.constant 0 : i32
    %c0_i32_0 = arith.constant 0 : i32
    %c0_i32_1 = arith.constant 0 : i32
    return %c0_i32, %c0_i32_0 : i32, i32
  }
  func.func @transform_2(%arg0: i32) -> (i32, i32, i32) {
    %c0_i32 = arith.constant 0 : i32
    %c0_i32_0 = arith.constant 0 : i32
    %c0_i32_1 = arith.constant 0 : i32
    return %arg0, %c0_i32, %c0_i32_0 : i32, i32, i32
  }
  func.func @transform_3(%arg0: i32) -> (i32, i32, i32) {
    %c0_i32 = arith.constant 0 : i32
    %c0_i32_0 = arith.constant 0 : i32
    %c0_i32_1 = arith.constant 0 : i32
    return %arg0, %c0_i32, %c0_i32_0 : i32, i32, i32
  }
}

module attributes {stable_mosaic.version = 11 : i64} {
  func.func @_cam_head_kernel_single(%arg0: i32, %arg1: memref<1x64x64xbf16, #tpu.memory_space<vmem>>, %arg2: memref<20x64xbf16, #tpu.memory_space<vmem>>, %arg3: memref<1x20x64xbf16, #tpu.memory_space<vmem>>, %arg4: memref<1x20x1xf32, #tpu.memory_space<vmem>>) attributes {dimension_semantics = [#tpu.dimension_semantics<parallel>], iteration_bounds = array<i64: 2>, scalar_prefetch = 0 : i64, scratch_operands = 0 : i64, tpu.core_type = #tpu.core_type<tc>, window_params = [{transform_indices = @transform_0, window_bounds = array<i64: 1, 64, 64>}, {pipeline_mode = #tpu.pipeline_mode<synchronous>, transform_indices = @transform_1, window_bounds = array<i64: 20, 64>}, {transform_indices = @transform_2, window_bounds = array<i64: 1, 20, 64>}, {transform_indices = @transform_3, window_bounds = array<i64: 1, 20, 1>}]} {
    %c0 = arith.constant 0 : index
    %c0_0 = arith.constant 0 : index
    %c0_1 = arith.constant 0 : index
    %0 = vector.load %arg1[%c0, %c0_0, %c0_1] : memref<1x64x64xbf16, #tpu.memory_space<vmem>>, vector<1x64x64xbf16>
    %1 = vector.shape_cast %0 : vector<1x64x64xbf16> to vector<64x64xbf16>
    %c0_2 = arith.constant 0 : index
    %c0_3 = arith.constant 0 : index
    %2 = vector.load %arg2[%c0_2, %c0_3] : memref<20x64xbf16, #tpu.memory_space<vmem>>, vector<20x64xbf16>
    %cst = arith.constant dense<0.000000e+00> : vector<20x64xf32>
    %3 = tpu.matmul %2, %1, %cst {dimension_numbers = #tpu.dot_dimension_numbers<[1], [0], [0], [1], [0, 0, 1, 1], [], []>} : vector<20x64xbf16>, vector<64x64xbf16>, vector<20x64xf32> -> vector<20x64xf32>
    %4 = arith.truncf %3 : vector<20x64xf32> to vector<20x64xbf16>
    %c0_4 = arith.constant 0 : index
    %c0_5 = arith.constant 0 : index
    %c0_6 = arith.constant 0 : index
    %5 = vector.load %arg3[%c0_4, %c0_5, %c0_6] : memref<1x20x64xbf16, #tpu.memory_space<vmem>>, vector<1x20x64xbf16>
    %6 = vector.shape_cast %5 : vector<1x20x64xbf16> to vector<20x64xbf16>
    %7 = vector.shape_cast %4 : vector<20x64xbf16> to vector<1x20x64xbf16>
    tpu.vector_store %arg3[%c0_4, %c0_5, %c0_6], %7 {strides = array<i32>} : memref<1x20x64xbf16, #tpu.memory_space<vmem>>, vector<1x20x64xbf16>,
    %8 = arith.extf %4 : vector<20x64xbf16> to vector<20x64xf32>
    %cst_7 = arith.constant dense<0xFF800000> : vector<20xf32>
    %9 = vector.multi_reduction <maximumf>, %8, %cst_7 [1] : vector<20x64xf32> to vector<20xf32>
    %10 = vector.shape_cast %9 : vector<20xf32> to vector<20x1xf32>
    %c0_8 = arith.constant 0 : index
    %c0_9 = arith.constant 0 : index
    %c0_10 = arith.constant 0 : index
    %11 = vector.load %arg4[%c0_8, %c0_9, %c0_10] : memref<1x20x1xf32, #tpu.memory_space<vmem>>, vector<1x20x1xf32>
    %12 = vector.shape_cast %11 : vector<1x20x1xf32> to vector<20x1xf32>
    %13 = vector.shape_cast %10 : vector<20x1xf32> to vector<1x20x1xf32>
    tpu.vector_store %arg4[%c0_8, %c0_9, %c0_10], %13 {strides = array<i32>} : memref<1x20x1xf32, #tpu.memory_space<vmem>>, vector<1x20x1xf32>,
    return
  }
  func.func @transform_0(%arg0: i32) -> (i32, i32, i32) {
    %c0_i32 = arith.constant 0 : i32
    %c0_i32_0 = arith.constant 0 : i32
    %c0_i32_1 = arith.constant 0 : i32
    return %arg0, %c0_i32, %c0_i32_0 : i32, i32, i32
  }
  func.func @transform_1(%arg0: i32) -> (i32, i32) {
    %c0_i32 = arith.constant 0 : i32
    %c0_i32_0 = arith.constant 0 : i32
    %c0_i32_1 = arith.constant 0 : i32
    return %c0_i32, %c0_i32_0 : i32, i32
  }
  func.func @transform_2(%arg0: i32) -> (i32, i32, i32) {
    %c0_i32 = arith.constant 0 : i32
    %c0_i32_0 = arith.constant 0 : i32
    %c0_i32_1 = arith.constant 0 : i32
    return %arg0, %c0_i32, %c0_i32_0 : i32, i32, i32
  }
  func.func @transform_3(%arg0: i32) -> (i32, i32, i32) {
    %c0_i32 = arith.constant 0 : i32
    %c0_i32_0 = arith.constant 0 : i32
    %c0_i32_1 = arith.constant 0 : i32
    return %arg0, %c0_i32, %c0_i32_0 : i32, i32, i32
  }
}

module attributes {stable_mosaic.version = 11 : i64} {
  func.func @_cam_head_kernel_single(%arg0: i32, %arg1: memref<1x32x256xbf16, #tpu.memory_space<vmem>>, %arg2: memref<20x32xbf16, #tpu.memory_space<vmem>>, %arg3: memref<1x20x256xbf16, #tpu.memory_space<vmem>>, %arg4: memref<1x20x1xf32, #tpu.memory_space<vmem>>) attributes {dimension_semantics = [#tpu.dimension_semantics<parallel>], iteration_bounds = array<i64: 2>, scalar_prefetch = 0 : i64, scratch_operands = 0 : i64, tpu.core_type = #tpu.core_type<tc>, window_params = [{transform_indices = @transform_0, window_bounds = array<i64: 1, 32, 256>}, {pipeline_mode = #tpu.pipeline_mode<synchronous>, transform_indices = @transform_1, window_bounds = array<i64: 20, 32>}, {transform_indices = @transform_2, window_bounds = array<i64: 1, 20, 256>}, {transform_indices = @transform_3, window_bounds = array<i64: 1, 20, 1>}]} {
    %c0 = arith.constant 0 : index
    %c0_0 = arith.constant 0 : index
    %c0_1 = arith.constant 0 : index
    %0 = vector.load %arg1[%c0, %c0_0, %c0_1] : memref<1x32x256xbf16, #tpu.memory_space<vmem>>, vector<1x32x256xbf16>
    %1 = vector.shape_cast %0 : vector<1x32x256xbf16> to vector<32x256xbf16>
    %c0_2 = arith.constant 0 : index
    %c0_3 = arith.constant 0 : index
    %2 = vector.load %arg2[%c0_2, %c0_3] : memref<20x32xbf16, #tpu.memory_space<vmem>>, vector<20x32xbf16>
    %cst = arith.constant dense<0.000000e+00> : vector<20x256xf32>
    %3 = tpu.matmul %2, %1, %cst {dimension_numbers = #tpu.dot_dimension_numbers<[1], [0], [0], [1], [0, 0, 1, 1], [], []>} : vector<20x32xbf16>, vector<32x256xbf16>, vector<20x256xf32> -> vector<20x256xf32>
    %4 = arith.truncf %3 : vector<20x256xf32> to vector<20x256xbf16>
    %c0_4 = arith.constant 0 : index
    %c0_5 = arith.constant 0 : index
    %c0_6 = arith.constant 0 : index
    %5 = vector.load %arg3[%c0_4, %c0_5, %c0_6] : memref<1x20x256xbf16, #tpu.memory_space<vmem>>, vector<1x20x256xbf16>
    %6 = vector.shape_cast %5 : vector<1x20x256xbf16> to vector<20x256xbf16>
    %7 = vector.shape_cast %4 : vector<20x256xbf16> to vector<1x20x256xbf16>
    tpu.vector_store %arg3[%c0_4, %c0_5, %c0_6], %7 {strides = array<i32>} : memref<1x20x256xbf16, #tpu.memory_space<vmem>>, vector<1x20x256xbf16>,
    %8 = arith.extf %4 : vector<20x256xbf16> to vector<20x256xf32>
    %cst_7 = arith.constant dense<0xFF800000> : vector<20xf32>
    %9 = vector.multi_reduction <maximumf>, %8, %cst_7 [1] : vector<20x256xf32> to vector<20xf32>
    %10 = vector.shape_cast %9 : vector<20xf32> to vector<20x1xf32>
    %c0_8 = arith.constant 0 : index
    %c0_9 = arith.constant 0 : index
    %c0_10 = arith.constant 0 : index
    %11 = vector.load %arg4[%c0_8, %c0_9, %c0_10] : memref<1x20x1xf32, #tpu.memory_space<vmem>>, vector<1x20x1xf32>
    %12 = vector.shape_cast %11 : vector<1x20x1xf32> to vector<20x1xf32>
    %13 = vector.shape_cast %10 : vector<20x1xf32> to vector<1x20x1xf32>
    tpu.vector_store %arg4[%c0_8, %c0_9, %c0_10], %13 {strides = array<i32>} : memref<1x20x1xf32, #tpu.memory_space<vmem>>, vector<1x20x1xf32>,
    return
  }
  func.func @transform_0(%arg0: i32) -> (i32, i32, i32) {
    %c0_i32 = arith.constant 0 : i32
    %c0_i32_0 = arith.constant 0 : i32
    %c0_i32_1 = arith.constant 0 : i32
    return %arg0, %c0_i32, %c0_i32_0 : i32, i32, i32
  }
  func.func @transform_1(%arg0: i32) -> (i32, i32) {
    %c0_i32 = arith.constant 0 : i32
    %c0_i32_0 = arith.constant 0 : i32
    %c0_i32_1 = arith.constant 0 : i32
    return %c0_i32, %c0_i32_0 : i32, i32
  }
  func.func @transform_2(%arg0: i32) -> (i32, i32, i32) {
    %c0_i32 = arith.constant 0 : i32
    %c0_i32_0 = arith.constant 0 : i32
    %c0_i32_1 = arith.constant 0 : i32
    return %arg0, %c0_i32, %c0_i32_0 : i32, i32, i32
  }
  func.func @transform_3(%arg0: i32) -> (i32, i32, i32) {
    %c0_i32 = arith.constant 0 : i32
    %c0_i32_0 = arith.constant 0 : i32
    %c0_i32_1 = arith.constant 0 : i32
    return %arg0, %c0_i32, %c0_i32_0 : i32, i32, i32
  }
}

</mosaic_0001>

<bundles_post_ra>
// kernel: mitcls_cam_multi4_forward.6
= control target key start
LH: loop header
LB: loop body
LE: loop exit
PB: predicated region body
PF: predicated region fallthrough
CT: control target
= control target key end

     0   :  { %s520_s12 = smov 0   ;;  %s553_s0 = inlined_call_operand.vmem [shape: bf16[2,96,16], index: 0, kind: input, shape index: {}]   ;;  %s554_s1 = inlined_call_operand.vmem [shape: bf16[20,96], index: 1, kind: input, shape index: {}]   ;;  %s555_s2 = inlined_call_operand.vmem [shape: bf16[2,20,16], index: 2, kind: output, shape index: {0}]   ;;  %s556_s3 = inlined_call_operand.vmem [shape: f32[2,20,1], index: 3, kind: output, shape index: {1}]  }
   0x1 LB: > { %s423_s13 = sadd.s32 4294967295, %s498_s12   ;;  %p427_p0 = scmp.ge.s32.totalorder %s498_s12, 1  ;;  %s498_s12 = sphi %s520_s12, %s14_s12  }
   0x2   : > { %p140_p1 = scmp.lt.s32.totalorder %s498_s12, 3 }
   0x4   : > { %p141_p2 = pnand %p427_p0, %p140_p1 }
   0x5   : > { %p169_p3 = scmp.lt.s32.totalorder (!%p141_p2), %s423_s13, 1 }
   0x6   : > { %144 = sbr.rel (%p141_p2) target bundleno = 387 (0x183), region = 28 }
   0xb   : > { %v490_v0 = vld [vmem:[%s554_s1] sm:$0xff]   ;;  %vm244_vm0 = vcmask 785408   ;;  %s558_s13 = smov (!%p169_p3, %s423_s13), 1  ;;  %v491_v7 = vld [vmem:[%s554_s1 + $0x8] ss:$0 sps:$4 sm:$0x33]  }
   0xc   : > { %469 = vmatprep.mubr.msk.bf16.mxu0 %vm244_vm0, %v490_v0  ;;  %s473_s16 = smul.u32 48, %s558_s13  ;;  %vm315_vm1 = vcmask 123904   ;;  %vm312_vm2 = vcmask 125952   ;;  %vm320_vm3 = vcmask 130048   ;;  %vm333_vm4 = vcmask 3072  }
   0xd   : > { %s474_s22 = smul.u32 12, %s558_s13  ;;  %vm330_vm5 = vcmask 7168  }
   0xe   : > { %s173_s19 = scalar_lea.vmem %s553_s0, %s473_s16  ;;  %s475_s26 = smul.u32 24, %s558_s13 }
   0xf   : > { %v484_v1 = vld [vmem:[%s173_s19 + $0x28] sm:$0xff]   ;;  %v485_v2 = vld [vmem:[%s173_s19 + $0x20] sm:$0xff]   ;;  %v486_v3 = vld [vmem:[%s173_s19 + $0x18] sm:$0xff]   ;;  %s178_s25 = scalar_lea.vmem %s555_s2, %s474_s22 }
  0x10   : > { %457 = vmatprep.subr.bf16.mxu0 %v484_v1  ;;  %v487_v4 = vld [vmem:[%s173_s19 + $0x10] sm:$0xff]   ;;  %v488_v5 = vld [vmem:[%s173_s19 + $0x8] sm:$0xff]   ;;  %v489_v6 = vld [vmem:[%s173_s19] sm:$0xff]   ;;  %s183_s29 = scalar_lea.vmem %s556_s3, %s475_s26 }
  0x11   : > { %458 = vmatpush3.bf16.msra.mxu0 %v484_v1 }
  0x12   : > { %459 = vmatprep.subr.bf16.mxu0 %v485_v2 }
  0x15   : > { %460 = vmatpush3.bf16.msra.mxu0 %v485_v2 }
  0x16   : > { %461 = vmatprep.subr.bf16.mxu0 %v486_v3 }
  0x19   : > { %462 = vmatpush3.bf16.msra.mxu0 %v486_v3 }
  0x1a   : > { %463 = vmatprep.subr.bf16.mxu0 %v487_v4 }
  0x1d   : > { %464 = vmatpush3.bf16.msra.mxu0 %v487_v4 }
  0x1e   : > { %465 = vmatprep.subr.bf16.mxu0 %v488_v5 }
  0x21   : > { %466 = vmatpush3.bf16.msra.mxu0 %v488_v5 }
  0x22   : > { %467 = vmatprep.subr.bf16.mxu0 %v489_v6 }
  0x25   : > { %468 = vmatpush3.bf16.msra.mxu0 %v489_v6 }
  0x28   : > { %470 = vmatmul.mubr.msk.bf16.vlgmr.msra.gmra.mxu0 %vm244_vm0, %v491_v7 }
  0xe8   : > { %v471_v8 = vpop.f32.mrf.mxu0 }
  0xe9   : > { %v300_v9 = vpack.c.bf16 %v471_v8, %v471_v8 }
  0xea   : > { %v285_v10 = vpop.f32.mrf.mxu0 }
  0xeb   : > { %316 = vst.msk [vmem:[%s178_s25 + $0x8] sm:$0x3] %vm315_vm1, %v300_v9  ;;  %v446_v11 = vpack.c.bf16 %v285_v10, %v285_v10  ;;  %v319_v12 = vunpack.c.l.bf16 %v300_v9 }
  0xec   : > { %v472_v13 = vpop.f32.mrf.mxu0 }
  0xed   : > { %v327_v14 = vsel %vm312_vm2, %v319_v12, -inf  ;;  %313 = vst.msk [vmem:[%s178_s25] sm:$0xf] %vm312_vm2, %v446_v11 }
  0xee   : > { %328 = vmax.xlane.f32.xlu1 %v327_v14  ;;  %v288_v15 = vpop.f32.mrf.mxu0 }
  0xef   : > { %v299_v16 = vpack.c.bf16 %v288_v15, %v285_v10  ;;  %v447_v17 = vpack.c.bf16 %v288_v15, %v288_v15 }
  0xf1   : > { %314 = vst.msk [vmem:[%s178_s25 + $0x4] sm:$0xf] %vm312_vm2, %v447_v17  ;;  %v317_v18 = vunpack.c.l.bf16 %v299_v16  ;;  %v318_v20 = vunpack.c.h.bf16 %v299_v16 }
  0xf3   : > { %v321_v19 = vsel %vm320_vm3, %v317_v18, -inf  ;;  %v324_v21 = vsel %vm320_vm3, %v318_v20, -inf }
  0xf4   : > { %322 = vmax.xlane.f32.xlu0 %v321_v19 }
  0xf8   : > { %325 = vmax.xlane.f32.xlu0 %v324_v21 }
 0x177   : > { %v329_v22 = vpop.xlane.xlu1 %328 }
 0x178   : > { %334 = vst.msk [vmem:[%s183_s29 + $0x10] sm:$0xf] %vm333_vm4, %v329_v22 }
 0x17d   : > { %v323_v23 = vpop.xlane.xlu0 %322 }
 0x17e   : > { %331 = vst.msk [vmem:[%s183_s29] sm:$0xff] %vm330_vm5, %v323_v23 }
 0x181   : > { %v326_v24 = vpop.xlane.xlu0 %325 }
 0x182   : > { %332 = vst.msk [vmem:[%s183_s29 + $0x8] sm:$0xff] %vm330_vm5, %v326_v24 }
 0x183 PF: > { %s14_s12 = sadd.s32 1, %s498_s12  }
 0x184   : > { %p11_p4 = scmp.ge.s32.totalorder %s14_s12, 4  }
 0x186   :  { %13 = sbr.rel (!%p11_p4) target bundleno = 1 (0x1), region = 70 }

// kernel: mitcls_cam_multi4_forward.7
= control target key start
LH: loop header
LB: loop body
LE: loop exit
PB: predicated region body
PF: predicated region fallthrough
CT: control target
= control target key end

     0   :  { %s540_s12 = smov 0   ;;  %s571_s0 = inlined_call_operand.vmem [shape: bf16[2,128,4], index: 0, kind: input, shape index: {}]   ;;  %s572_s1 = inlined_call_operand.vmem [shape: bf16[20,128], index: 1, kind: input, shape index: {}]   ;;  %s573_s2 = inlined_call_operand.vmem [shape: bf16[2,20,4], index: 2, kind: output, shape index: {0}]   ;;  %s574_s3 = inlined_call_operand.vmem [shape: f32[2,20,1], index: 3, kind: output, shape index: {1}]  }
   0x1 LB: > { %s434_s13 = sadd.s32 4294967295, %s518_s12   ;;  %p438_p0 = scmp.ge.s32.totalorder %s518_s12, 1  ;;  %s518_s12 = sphi %s540_s12, %s14_s12  }
   0x2   : > { %p140_p1 = scmp.lt.s32.totalorder %s518_s12, 3 }
   0x4   : > { %p141_p2 = pnand %p438_p0, %p140_p1 }
   0x5   : > { %p169_p3 = scmp.lt.s32.totalorder (!%p141_p2), %s434_s13, 1 }
   0x6   : > { %144 = sbr.rel (%p141_p2) target bundleno = 394 (0x18a), region = 28 }
   0xb   : > { %v510_v0 = vld [vmem:[%s572_s1] sm:$0xff]   ;;  %s576_s13 = smov (!%p169_p3, %s434_s13), 1  ;;  %v511_v9 = vld [vmem:[%s572_s1 + $0x8] ss:$0 sps:$4 sm:$0x33]   ;;  %vm326_vm0 = vcmask 25600  }
   0xc   : > { %488 = vmatprep.mubr.bf16.mxu0 %v510_v0  ;;  %s458_s16 = sshll.u32 %s576_s13, 6  ;;  %s492_s22 = smul.u32 12, %s576_s13  ;;  %vm323_vm1 = vcmask 27648   ;;  %vm331_vm2 = vcmask 31744   ;;  %vm344_vm3 = vcmask 3072   ;;  %vm341_vm4 = vcmask 7168  }
   0xd   : > { %s173_s19 = scalar_lea.vmem %s571_s0, %s458_s16  ;;  %s493_s26 = smul.u32 24, %s576_s13 }
   0xe   : > { %v502_v1 = vld [vmem:[%s173_s19 + $0x38] sm:$0xff]   ;;  %v503_v2 = vld [vmem:[%s173_s19 + $0x30] sm:$0xff]   ;;  %v504_v3 = vld [vmem:[%s173_s19 + $0x28] sm:$0xff]   ;;  %s178_s25 = scalar_lea.vmem %s573_s2, %s492_s22 }
   0xf   : > { %472 = vmatprep.subr.bf16.mxu0 %v502_v1  ;;  %v505_v4 = vld [vmem:[%s173_s19 + $0x20] sm:$0xff]   ;;  %v506_v5 = vld [vmem:[%s173_s19 + $0x18] sm:$0xff]   ;;  %v507_v6 = vld [vmem:[%s173_s19 + $0x10] sm:$0xff]   ;;  %s183_s29 = scalar_lea.vmem %s574_s3, %s493_s26 }
  0x10   : > { %473 = vmatpush3.bf16.msra.mxu0 %v502_v1  ;;  %v508_v7 = vld [vmem:[%s173_s19 + $0x8] sm:$0xff]   ;;  %v509_v8 = vld [vmem:[%s173_s19] sm:$0xff]  }
  0x11   : > { %474 = vmatprep.subr.bf16.mxu0 %v503_v2 }
  0x14   : > { %475 = vmatpush3.bf16.msra.mxu0 %v503_v2 }
  0x15   : > { %476 = vmatprep.subr.bf16.mxu0 %v504_v3 }
  0x18   : > { %477 = vmatpush3.bf16.msra.mxu0 %v504_v3 }
  0x19   : > { %478 = vmatprep.subr.bf16.mxu0 %v505_v4 }
  0x1c   : > { %479 = vmatpush3.bf16.msra.mxu0 %v505_v4 }
  0x1d   : > { %480 = vmatprep.subr.bf16.mxu0 %v506_v5 }
  0x20   : > { %481 = vmatpush3.bf16.msra.mxu0 %v506_v5 }
  0x21   : > { %482 = vmatprep.subr.bf16.mxu0 %v507_v6 }
  0x24   : > { %483 = vmatpush3.bf16.msra.mxu0 %v507_v6 }
  0x25   : > { %484 = vmatprep.subr.bf16.mxu0 %v508_v7 }
  0x28   : > { %485 = vmatpush3.bf16.msra.mxu0 %v508_v7 }
  0x29   : > { %486 = vmatprep.subr.bf16.mxu0 %v509_v8 }
  0x2c   : > { %487 = vmatpush3.bf16.msra.mxu0 %v509_v8 }
  0x2f   : > { %489 = vmatmul.mubr.bf16.vlgmr.msra.gmra.mxu0 %v511_v9 }
  0xef   : > { %v490_v10 = vpop.f32.mrf.mxu0 }
  0xf0   : > { %v311_v11 = vpack.c.bf16 %v490_v10, %v490_v10 }
  0xf1   : > { %v296_v12 = vpop.f32.mrf.mxu0 }
  0xf2   : > { %327 = vst.msk [vmem:[%s178_s25 + $0x8] sm:$0x3] %vm326_vm0, %v311_v11  ;;  %v459_v13 = vpack.c.bf16 %v296_v12, %v296_v12  ;;  %v330_v14 = vunpack.c.l.bf16 %v311_v11 }
  0xf3   : > { %v491_v15 = vpop.f32.mrf.mxu0 }
  0xf4   : > { %v338_v16 = vsel %vm323_vm1, %v330_v14, -inf  ;;  %324 = vst.msk [vmem:[%s178_s25] sm:$0xf] %vm323_vm1, %v459_v13 }
  0xf5   : > { %339 = vmax.xlane.f32.xlu1 %v338_v16  ;;  %v299_v17 = vpop.f32.mrf.mxu0 }
  0xf6   : > { %v310_v18 = vpack.c.bf16 %v299_v17, %v296_v12  ;;  %v460_v19 = vpack.c.bf16 %v299_v17, %v299_v17 }
  0xf8   : > { %325 = vst.msk [vmem:[%s178_s25 + $0x4] sm:$0xf] %vm323_vm1, %v460_v19  ;;  %v328_v20 = vunpack.c.l.bf16 %v310_v18  ;;  %v329_v22 = vunpack.c.h.bf16 %v310_v18 }
  0xfa   : > { %v332_v21 = vsel %vm331_vm2, %v328_v20, -inf  ;;  %v335_v23 = vsel %vm331_vm2, %v329_v22, -inf }
  0xfb   : > { %333 = vmax.xlane.f32.xlu0 %v332_v21 }
  0xff   : > { %336 = vmax.xlane.f32.xlu0 %v335_v23 }
 0x17e   : > { %v340_v24 = vpop.xlane.xlu1 %339 }
 0x17f   : > { %345 = vst.msk [vmem:[%s183_s29 + $0x10] sm:$0xf] %vm344_vm3, %v340_v24 }
 0x184   : > { %v334_v25 = vpop.xlane.xlu0 %333 }
 0x185   : > { %342 = vst.msk [vmem:[%s183_s29] sm:$0xff] %vm341_vm4, %v334_v25 }
 0x188   : > { %v337_v26 = vpop.xlane.xlu0 %336 }
 0x189   : > { %343 = vst.msk [vmem:[%s183_s29 + $0x8] sm:$0xff] %vm341_vm4, %v337_v26 }
 0x18a PF: > { %s14_s12 = sadd.s32 1, %s518_s12  }
 0x18b   : > { %p11_p4 = scmp.ge.s32.totalorder %s14_s12, 4  }
 0x18d   :  { %13 = sbr.rel (!%p11_p4) target bundleno = 1 (0x1), region = 70 }

// kernel: mitcls_cam_multi4_forward.5
= control target key start
LH: loop header
LB: loop body
LE: loop exit
PB: predicated region body
PF: predicated region fallthrough
CT: control target
= control target key end

     0   :  { %s494_s12 = smov 0   ;;  %s529_s0 = inlined_call_operand.vmem [shape: bf16[2,64,64], index: 0, kind: input, shape index: {}]   ;;  %s530_s1 = inlined_call_operand.vmem [shape: bf16[20,64], index: 1, kind: input, shape index: {}]   ;;  %s531_s2 = inlined_call_operand.vmem [shape: bf16[2,20,64], index: 2, kind: output, shape index: {0}]   ;;  %s532_s3 = inlined_call_operand.vmem [shape: f32[2,20,1], index: 3, kind: output, shape index: {1}]  }
   0x1 LB: > { %s406_s13 = sadd.s32 4294967295, %s472_s12   ;;  %p410_p0 = scmp.ge.s32.totalorder %s472_s12, 1  ;;  %s472_s12 = sphi %s494_s12, %s14_s12  }
   0x2   : > { %p140_p1 = scmp.lt.s32.totalorder %s472_s12, 3 }
   0x4   : > { %p141_p2 = pnand %p410_p0, %p140_p1 }
   0x5   : > { %p169_p3 = scmp.lt.s32.totalorder (!%p141_p2), %s406_s13, 1 }
   0x6   : > { %144 = sbr.rel (%p141_p2) target bundleno = 378 (0x17a), region = 28 }
   0xb   : > { %v464_v0 = vld [vmem:[%s530_s1] sm:$0xff]   ;;  %vm228_vm0 = vcmask 523264   ;;  %s534_s13 = smov (!%p169_p3, %s406_s13), 1  ;;  %v465_v5 = vld [vmem:[%s530_s1 + $0x8] ss:$0 sps:$4 sm:$0x33]  }
   0xc   : > { %446 = vmatprep.mubr.msk.bf16.mxu0 %vm228_vm0, %v464_v0  ;;  %s428_s16 = sshll.u32 %s534_s13, 5  ;;  %s450_s22 = smul.u32 12, %s534_s13  ;;  %vm299_vm1 = vcmask 517120   ;;  %vm296_vm2 = vcmask 519168   ;;  %vm316_vm3 = vcmask 3072   ;;  %vm313_vm4 = vcmask 7168  }
   0xd   : > { %s173_s19 = scalar_lea.vmem %s529_s0, %s428_s16  ;;  %s451_s26 = smul.u32 24, %s534_s13 }
   0xe   : > { %v460_v1 = vld [vmem:[%s173_s19 + $0x18] sm:$0xff]   ;;  %v461_v2 = vld [vmem:[%s173_s19 + $0x10] sm:$0xff]   ;;  %v462_v3 = vld [vmem:[%s173_s19 + $0x8] sm:$0xff]   ;;  %s178_s25 = scalar_lea.vmem %s531_s2, %s450_s22 }
   0xf   : > { %438 = vmatprep.subr.bf16.mxu0 %v460_v1  ;;  %v463_v4 = vld [vmem:[%s173_s19] sm:$0xff]   ;;  %s183_s29 = scalar_lea.vmem %s532_s3, %s451_s26 }
  0x10   : > { %439 = vmatpush3.bf16.msra.mxu0 %v460_v1 }
  0x11   : > { %440 = vmatprep.subr.bf16.mxu0 %v461_v2 }
  0x14   : > { %441 = vmatpush3.bf16.msra.mxu0 %v461_v2 }
  0x15   : > { %442 = vmatprep.subr.bf16.mxu0 %v462_v3 }
  0x18   : > { %443 = vmatpush3.bf16.msra.mxu0 %v462_v3 }
  0x19   : > { %444 = vmatprep.subr.bf16.mxu0 %v463_v4 }
  0x1c   : > { %445 = vmatpush3.bf16.msra.mxu0 %v463_v4 }
  0x1f   : > { %447 = vmatmul.mubr.msk.bf16.vlgmr.msra.gmra.mxu0 %vm228_vm0, %v465_v5 }
  0xdf   : > { %v448_v6 = vpop.f32.mrf.mxu0 }
  0xe0   : > { %v284_v7 = vpack.c.bf16 %v448_v6, %v448_v6 }
  0xe1   : > { %v269_v8 = vpop.f32.mrf.mxu0 }
  0xe2   : > { %300 = vst.msk [vmem:[%s178_s25 + $0x8] sm:$0x3] %vm299_vm1, %v284_v7  ;;  %v429_v9 = vpack.c.bf16 %v269_v8, %v269_v8  ;;  %v303_v10 = vunpack.c.l.bf16 %v284_v7 }
  0xe3   : > { %v449_v11 = vpop.f32.mrf.mxu0 }
  0xe4   : > { %v310_v12 = vsel %vm296_vm2, %v303_v10, -inf  ;;  %297 = vst.msk [vmem:[%s178_s25] sm:$0xf] %vm296_vm2, %v429_v9 }
  0xe5   : > { %311 = vmax.xlane.f32.xlu1 %v310_v12  ;;  %v272_v13 = vpop.f32.mrf.mxu0 }
  0xe6   : > { %v283_v14 = vpack.c.bf16 %v272_v13, %v269_v8  ;;  %v430_v15 = vpack.c.bf16 %v272_v13, %v272_v13 }
  0xe8   : > { %298 = vst.msk [vmem:[%s178_s25 + $0x4] sm:$0xf] %vm296_vm2, %v430_v15  ;;  %v301_v16 = vunpack.c.l.bf16 %v283_v14  ;;  %v302_v18 = vunpack.c.h.bf16 %v283_v14 }
  0xea   : > { %v304_v17 = vsel %vm228_vm0, %v301_v16, -inf  ;;  %v307_v19 = vsel %vm228_vm0, %v302_v18, -inf }
  0xeb   : > { %305 = vmax.xlane.f32.xlu0 %v304_v17 }
  0xef   : > { %308 = vmax.xlane.f32.xlu0 %v307_v19 }
 0x16e   : > { %v312_v20 = vpop.xlane.xlu1 %311 }
 0x16f   : > { %317 = vst.msk [vmem:[%s183_s29 + $0x10] sm:$0xf] %vm316_vm3, %v312_v20 }
 0x174   : > { %v306_v21 = vpop.xlane.xlu0 %305 }
 0x175   : > { %314 = vst.msk [vmem:[%s183_s29] sm:$0xff] %vm313_vm4, %v306_v21 }
 0x178   : > { %v309_v22 = vpop.xlane.xlu0 %308 }
 0x179   : > { %315 = vst.msk [vmem:[%s183_s29 + $0x8] sm:$0xff] %vm313_vm4, %v309_v22 }
 0x17a PF: > { %s14_s12 = sadd.s32 1, %s472_s12  }
 0x17b   : > { %p11_p4 = scmp.ge.s32.totalorder %s14_s12, 4  }
 0x17d   :  { %13 = sbr.rel (!%p11_p4) target bundleno = 1 (0x1), region = 70 }

// kernel: mitcls_cam_multi4_forward.4
= control target key start
LH: loop header
LB: loop body
LE: loop exit
PB: predicated region body
PF: predicated region fallthrough
CT: control target
= control target key end

     0   :  { %s489_s12 = smov 0   ;;  %s525_s0 = inlined_call_operand.vmem [shape: bf16[2,32,256], index: 0, kind: input, shape index: {}]   ;;  %s526_s1 = inlined_call_operand.vmem [shape: bf16[20,32], index: 1, kind: input, shape index: {}]   ;;  %s527_s2 = inlined_call_operand.vmem [shape: bf16[2,20,256], index: 2, kind: output, shape index: {0}]   ;;  %s528_s3 = inlined_call_operand.vmem [shape: f32[2,20,1], index: 3, kind: output, shape index: {1}]  }
   0x1 LB: > { %s412_s13 = sadd.s32 4294967295, %s466_s12   ;;  %p416_p0 = scmp.ge.s32.totalorder %s466_s12, 1  ;;  %s466_s12 = sphi %s489_s12, %s14_s12  }
   0x2   : > { %p140_p1 = scmp.lt.s32.totalorder %s466_s12, 3 }
   0x4   : > { %p141_p2 = pnand %p416_p0, %p140_p1 }
   0x5   : > { %p169_p3 = scmp.lt.s32.totalorder (!%p141_p2), %s412_s13, 1 }
   0x6   : > { %144 = sbr.rel (%p141_p2) target bundleno = 371 (0x173), region = 28 }
   0xb   : > { %v468_v0 = vmov 0   ;;  %s530_s13 = smov (!%p169_p3, %s412_s13), 1  ;;  %v458_v5 = vld [vmem:[%s526_s1] sm:$0xff]   ;;  %v459_v6 = vld [vmem:[%s526_s1 + $0x8] ss:$0 sps:$4 sm:$0x33]  }
   0xc   : > { %259 = vmatprep.mubr.bf16.mxu0 %v468_v0  ;;  %269 = vmatprep.mubr.bf16.mxu1 %v468_v0  ;;  %s434_s14 = sshll.u32 %s530_s13, 5  ;;  %vm220_vm0 = vcmask 261120   ;;  %s442_s22 = smul.u32 24, %s530_s13  ;;  %vm313_vm1 = vcmask 1043456   ;;  %vm322_vm2 = vcmask 3072   ;;  %vm319_vm3 = vcmask 7168  }
   0xd   : > { %s173_s17 = scalar_lea.vmem %s525_s0, %s434_s14 }
   0xe   : > { %v452_v1 = vld [vmem:[%s173_s17 + $0x14] ss:$8 sps:$4 sm:$0xff]   ;;  %v454_v2 = vld [vmem:[%s173_s17 + $0x10] ss:$8 sps:$4 sm:$0xff]   ;;  %v455_v3 = vld [vmem:[%s173_s17 + $0x4] ss:$8 sps:$4 sm:$0xff]   ;;  %s178_s25 = scalar_lea.vmem %s527_s2, %s442_s22  ;;  %s183_s28 = scalar_lea.vmem %s528_s3, %s442_s22 }
   0xf   : > { %239 = vmatprep.subr.bf16.mxu0 %v452_v1  ;;  %438 = vmatprep.subr.bf16.mxu1 %v452_v1  ;;  %v457_v4 = vld [vmem:[%s173_s17] ss:$8 sps:$4 sm:$0xff]  }
  0x10   : > { %240 = vmatpush1.bf16.msra.mxu0 %v454_v2  ;;  %440 = vmatpush1.bf16.msra.mxu1 %v454_v2 }
  0x11   : > { %241 = vmatprep.subr.bf16.mxu0 %v455_v3  ;;  %439 = vmatprep.subr.bf16.mxu1 %v455_v3 }
  0x14   : > { %242 = vmatpush1.bf16.msra.mxu0 %v457_v4  ;;  %441 = vmatpush1.bf16.msra.mxu1 %v457_v4 }
  0x17   : > { %427 = vmatmul.mubr.msk.bf16.vlgmr.msra.gmra.mxu0 %vm220_vm0, %v458_v5  ;;  %428 = vmatmul.mubr.msk.bf16.vlgmr.msra.gmra.mxu1 %vm220_vm0, %v459_v6 }
  0xd7   : > { %v261_v7 = vpop.f32.mrf.mxu0  ;;  %v271_v8 = vpop.f32.mrf.mxu1 }
  0xd8   : > { %v280_v9 = vpack.c.bf16 %v271_v8, %v271_v8 }
  0xd9   : > { %v263_v10 = vpop.f32.mrf.mxu0  ;;  %v273_v11 = vpop.f32.mrf.mxu1 }
  0xda   : > { %v305_v12 = vunpack.c.l.bf16 %v280_v9  ;;  %v435_v13 = vpack.c.bf16 %v263_v10, %v261_v7  ;;  %v281_v14 = vpack.c.bf16 %v273_v11, %v273_v11  ;;  %v437_v15 = vpack.c.bf16 %v273_v11, %v271_v8 }
  0xdb   : > { %v265_v16 = vpop.f32.mrf.mxu0  ;;  %v275_v17 = vpop.f32.mrf.mxu1 }
  0xdc   : > { %298 = vst [vmem:[%s178_s25] sm:$0xff] %v435_v13  ;;  %300 = vst [vmem:[%s178_s25 + $0x10] sm:$0x33] %v437_v15  ;;  %v306_v18 = vunpack.c.l.bf16 %v281_v14  ;;  %v278_v19 = vpack.c.bf16 %v265_v16, %v261_v7  ;;  %v314_v20 = vsel %vm313_vm1, %v305_v12, -inf }
  0xdd   : > { %v267_v21 = vpop.f32.mrf.mxu0  ;;  %v276_v22 = vpop.f32.mrf.mxu1 }
  0xde   : > { %v279_v23 = vpack.c.bf16 %v267_v21, %v263_v10  ;;  %v436_v24 = vpack.c.bf16 %v267_v21, %v265_v16  ;;  %v315_v25 = vsel %vm313_vm1, %v306_v18, -inf  ;;  %v301_v27 = vunpack.c.l.bf16 %v278_v19 }
  0xdf   : > { %v316_v26 = vmax.f32 %v314_v20, %v315_v25  ;;  %v303_v31 = vunpack.c.h.bf16 %v278_v19 }
  0xe0   : > { %299 = vst [vmem:[%s178_s25 + $0x8] sm:$0xff] %v436_v24  ;;  %v302_v28 = vunpack.c.l.bf16 %v279_v23  ;;  %v304_v29 = vunpack.c.h.bf16 %v279_v23 }
  0xe1   : > { %317 = vmax.xlane.f32.xlu1 %v316_v26 }
  0xe2   : > { %v307_v30 = vmax.f32 %v301_v27, %v302_v28  ;;  %v310_v32 = vmax.f32 %v303_v31, %v304_v29 }
  0xe4   : > { %308 = vmax.xlane.f32.xlu0 %v307_v30 }
  0xe8   : > { %311 = vmax.xlane.f32.xlu0 %v310_v32 }
 0x16a   : > { %v318_v33 = vpop.xlane.xlu1 %317 }
 0x16b   : > { %323 = vst.msk [vmem:[%s183_s28 + $0x10] sm:$0xf] %vm322_vm2, %v318_v33 }
 0x16d   : > { %v309_v34 = vpop.xlane.xlu0 %308 }
 0x16e   : > { %320 = vst.msk [vmem:[%s183_s28] sm:$0xff] %vm319_vm3, %v309_v34 }
 0x171   : > { %v312_v35 = vpop.xlane.xlu0 %311 }
 0x172   : > { %321 = vst.msk [vmem:[%s183_s28 + $0x8] sm:$0xff] %vm319_vm3, %v312_v35 }
 0x173 PF: > { %s14_s12 = sadd.s32 1, %s466_s12  }
 0x174   : > { %p11_p4 = scmp.ge.s32.totalorder %s14_s12, 4  }
 0x176   :  { %13 = sbr.rel (!%p11_p4) target bundleno = 1 (0x1), region = 70 }

</bundles_post_ra>
